<compile_context>
chip_gen: v6e
topology: v6e:2x2x1
jax: 0.10.0
libtpu: 0.0.40
codegen_flags: <defaults>
</compile_context>

<pallas_src>
import math

import jax
import jax.numpy as jnp
from jax import lax
from jax.experimental import pallas as pl
from jax.experimental.pallas import tpu as pltpu


def _round_up(v, m):
    return ((v + m - 1) // m) * m


def _h_kernel(s_ref, w_ref, h_ref):
    # h = summary @ W : (1, Hp) @ (Hp, Hp) -> (1, Hp). Runs once.
    h_ref[...] = jnp.dot(
        s_ref[...], w_ref[...], preferred_element_type=jnp.float32
    ).astype(h_ref.dtype)


def _scores_kernel(h_ref, x_ref, o_ref):
    # scores_tile = h contracted with x_tile over the hidden dim:
    #   (1, Hp) . (TN, Hp) -> (1, TN)   (lane-dense output block)
    o_ref[...] = lax.dot_general(
        h_ref[...],
        x_ref[...],
        dimension_numbers=(((1,), (1,)), ((), ())),
        preferred_element_type=jnp.float32,
    ).astype(o_ref.dtype)


def discriminator_forward(x, summary, weight, *, tn=512):
    """x: [N, H] f32, summary: [H] f32, weight: [H, H] f32 -> scores: [N] f32."""
    n, hdim = x.shape
    hp = _round_up(hdim, 128)

    # Lane-dense hidden dim: pad H to a multiple of 128 (zeros don't change sums).
    if hp != hdim:
        x = jnp.pad(x, ((0, 0), (0, hp - hdim)))
        summary = jnp.pad(summary, (0, hp - hdim))
        weight = jnp.pad(weight, ((0, hp - hdim), (0, hp - hdim)))
    s2d = summary.reshape(1, hp)

    # --- h = summary @ W, computed once (hoisted out of the N-tiled path) ---
    h = pl.pallas_call(
        _h_kernel,
        out_shape=jax.ShapeDtypeStruct((1, hp), jnp.float32),
        grid_spec=pl.GridSpec(
            grid=(1,),
            in_specs=[
                pl.BlockSpec((1, hp), lambda i: (0, 0)),
                pl.BlockSpec((hp, hp), lambda i: (0, 0)),
            ],
            out_specs=pl.BlockSpec((1, hp), lambda i: (0, 0)),
        ),
        compiler_params=pltpu.CompilerParams(
            dimension_semantics=("arbitrary",)
        ),
    )(s2d, weight)

    # --- Tile size along N ---------------------------------------------------
    # Lane-dense (multiple of 128) output blocks; cap so that double-buffered
    # f32 x tiles (2 * TN * Hp * 4B) stay well under v7x's 32 MiB scoped VMEM.
    vmem_budget_bytes = 16 * 1024 * 1024
    tn_cap = max(128, (vmem_budget_bytes // (2 * hp * 4)) // 128 * 128)
    tn = max(128, min(tn, tn_cap, _round_up(n, 128)))

    num_tiles = -(-n // tn)
    n_pad = num_tiles * tn
    if n_pad != n:
        x = jnp.pad(x, ((0, n_pad - n), (0, 0)))

    # --- scores = h @ x^T, tiled over N with a parallel grid -----------------
    out = pl.pallas_call(
        _scores_kernel,
        out_shape=jax.ShapeDtypeStruct((1, n_pad), jnp.float32),
        grid_spec=pl.GridSpec(
            grid=(num_tiles,),
            in_specs=[
                pl.BlockSpec((1, hp), lambda i: (0, 0)),    # h: resident
                pl.BlockSpec((tn, hp), lambda i: (i, 0)),   # x tile: pipelined
            ],
            out_specs=pl.BlockSpec((1, tn), lambda i: (0, i)),  # lane-dense
        ),
        compiler_params=pltpu.CompilerParams(
            dimension_semantics=("parallel",),
        ),
    )(h, x)

    return out.reshape(n_pad)[:n]


def init_weight(key, hidden_dim):
    # Mirrors torch_geometric's `uniform(size, tensor)`:
    #   bound = 1 / sqrt(size); tensor.uniform_(-bound, bound)
    bound = 1.0 / math.sqrt(hidden_dim)
    return jax.random.uniform(
        key, (hidden_dim, hidden_dim), dtype=jnp.float32,
        minval=-bound, maxval=bound,
    )


def reference_forward(x, summary, weight):
    h = summary @ weight
    return jnp.sum(x * h, axis=1)


if __name__ == "__main__":
    key = jax.random.PRNGKey(0)
    k_w, k_x, k_s, k_w2, k_x2, k_s2 = jax.random.split(key, 6)

    # Small demo shapes consistent with the module: 8 nodes, hidden_dim=32.
    N, H = 8, 32
    weight = init_weight(k_w, H)
    x = jax.random.normal(k_x, (N, H), dtype=jnp.float32)
    summary = jax.random.normal(k_s, (H,), dtype=jnp.float32)

    scores = discriminator_forward(x, summary, weight)
    jax.block_until_ready(scores)
    ref = reference_forward(x, summary, weight)
    assert scores.shape == (N,)
    assert jnp.allclose(scores, ref, atol=1e-3, rtol=1e-3), (scores, ref)

    # Second check: non-aligned H and multiple N tiles (exercises padding +
    # the tiled parallel grid).
    N2, H2 = 300, 96
    weight2 = init_weight(k_w2, H2)
    x2 = jax.random.normal(k_x2, (N2, H2), dtype=jnp.float32)
    summary2 = jax.random.normal(k_s2, (H2,), dtype=jnp.float32)

    scores2 = discriminator_forward(x2, summary2, weight2, tn=128)
    jax.block_until_ready(scores2)
    ref2 = reference_forward(x2, summary2, weight2)
    assert scores2.shape == (N2,)
    assert jnp.allclose(scores2, ref2, atol=1e-3, rtol=1e-3)

    print("KERNEL_OK")
</pallas_src>

<mosaic_0001>
module attributes {stable_mosaic.version = 11 : i64} {
  func.func @_h_kernel(%arg0: i32, %arg1: memref<1x128xf32, #tpu.memory_space<vmem>>, %arg2: memref<128x128xf32, #tpu.memory_space<vmem>>, %arg3: memref<1x128xf32, #tpu.memory_space<vmem>>) attributes {dimension_semantics = [#tpu.dimension_semantics<arbitrary>], iteration_bounds = array<i64: 1>, scalar_prefetch = 0 : i64, scratch_operands = 0 : i64, tpu.core_type = #tpu.core_type<tc>, window_params = [{pipeline_mode = #tpu.pipeline_mode<synchronous>, transform_indices = @transform_0, window_bounds = array<i64: 1, 128>}, {pipeline_mode = #tpu.pipeline_mode<synchronous>, transform_indices = @transform_1, window_bounds = array<i64: 128, 128>}, {pipeline_mode = #tpu.pipeline_mode<synchronous>, transform_indices = @transform_2, window_bounds = array<i64: 1, 128>}]} {
    %c0 = arith.constant 0 : index
    %c0_0 = arith.constant 0 : index
    %0 = vector.load %arg1[%c0, %c0_0] : memref<1x128xf32, #tpu.memory_space<vmem>>, vector<1x128xf32>
    %c0_1 = arith.constant 0 : index
    %c0_2 = arith.constant 0 : index
    %1 = vector.load %arg2[%c0_1, %c0_2] : memref<128x128xf32, #tpu.memory_space<vmem>>, vector<128x128xf32>
    %cst = arith.constant dense<0.000000e+00> : vector<1x128xf32>
    %2 = tpu.matmul %0, %1, %cst {dimension_numbers = #tpu.dot_dimension_numbers<[1], [0], [0], [1], [0, 0, 1, 1], [], []>} : vector<1x128xf32>, vector<128x128xf32>, vector<1x128xf32> -> vector<1x128xf32>
    %c0_3 = arith.constant 0 : index
    %c0_4 = arith.constant 0 : index
    %3 = vector.load %arg3[%c0_3, %c0_4] : memref<1x128xf32, #tpu.memory_space<vmem>>, vector<1x128xf32>
    tpu.vector_store %arg3[%c0_3, %c0_4], %2 {strides = array<i32>} : memref<1x128xf32, #tpu.memory_space<vmem>>, vector<1x128xf32>,
    return
  }
  func.func @transform_0(%arg0: i32) -> (i32, i32) {
    %c0_i32 = arith.constant 0 : i32
    %c0_i32_0 = arith.constant 0 : i32
    %c0_i32_1 = arith.constant 0 : i32
    return %c0_i32, %c0_i32_0 : i32, i32
  }
  func.func @transform_1(%arg0: i32) -> (i32, i32) {
    %c0_i32 = arith.constant 0 : i32
    %c0_i32_0 = arith.constant 0 : i32
    %c0_i32_1 = arith.constant 0 : i32
    return %c0_i32, %c0_i32_0 : i32, i32
  }
  func.func @transform_2(%arg0: i32) -> (i32, i32) {
    %c0_i32 = arith.constant 0 : i32
    %c0_i32_0 = arith.constant 0 : i32
    %c0_i32_1 = arith.constant 0 : i32
    return %c0_i32, %c0_i32_0 : i32, i32
  }
}

</mosaic_0001>

<bundles_post_ra>
// kernel: tpu_custom_call.1
= control target key start
LH: loop header
LB: loop body
LE: loop exit
PB: predicated region body
PF: predicated region fallthrough
CT: control target
= control target key end

     0   :  { %7 = vsyncpa [#allocation3], 0  ;;  %s298_s0 = inlined_call_operand.hbm [shape: f32[1,128], index: 0, kind: input, shape index: {}]   ;;  %s299_s1 = inlined_call_operand.hbm [shape: f32[128,128], index: 1, kind: input, shape index: {}]   ;;  %s300_s2 = inlined_call_operand.hbm [shape: f32[1,128], index: 2, kind: output, shape index: {}]  }
   0x1   :  { %8 = vsyncpa [#allocation6], 0 }
   0x2   :  { %9 = vsyncpa [#allocation4], 0  ;;  %s267_s9 = smov [#allocation2]   ;;  %s268_s11 = smov [#allocation5]  }
   0x3   :  { %s16_s10 = sshll.u32 %s267_s9, 4  ;;  %s25_s12 = sshll.u32 %s268_s11, 4  ;;  %s17_s10 = int_to_ptr.vmem [resolvable:$true] %s16_s10  ;;  %s26_s12 = int_to_ptr.vmem [resolvable:$true] %s25_s12 }
   0x4   :  { %s209_s13 = scalar_lea.vmem %s17_s10, 16  ;;  %s213_s14 = scalar_lea.vmem %s17_s10, 32 }
   0x5   :  { %p210_p0 = scmp.ne.s32.totalorder %s17_s10, %s209_s13  ;;  %p214_p1 = scmp.lt.s32.totalorder %s17_s10, %s17_s10 }
   0x6   :  { %p215_p2 = scmp.lt.s32.totalorder %s213_s14, %s209_s13 }
   0x8   :  { %p216_p3 = por %p215_p2, %p214_p1 }
   0xa   :  { %p217_p4 = pnand %p216_p3, %p210_p0 }
   0xc   :  { %220 = shalt.err (!%p217_p4)
}
   0xd   :  { %19 = dma.hbm_to_vmem [thread:$0]  %s298_s0, 16, %s17_s10, [#allocation3]  }
   0xe   :  { %s229_s17 = scalar_lea.vmem %s26_s12, 2048  ;;  %p234_p6 = scmp.lt.s32.totalorder %s26_s12, %s26_s12 }
   0xf   :  { %p230_p5 = scmp.ne.s32.totalorder %s26_s12, %s229_s17  ;;  %p235_p7 = scmp.lt.s32.totalorder %s229_s17, %s229_s17 }
  0x11   :  { %p236_p8 = por %p235_p7, %p234_p6 }
  0x13   :  { %p237_p9 = pnand %p236_p8, %p230_p5 }
  0x15   :  { %240 = shalt.err (!%p237_p9)
}
  0x16   :  { %s269_s18 = smov 128   ;;  %s270_s19 = smov 8  }
  0x17   :  { %31 = dma.hbm_to_vmem [thread:$0]  %s299_s1, 2048, %s26_s12, [#allocation6], %s269_s18, %s269_s18, %s270_s19  }
  0x18   :  { %261 = dma.done.wait [#allocation3], 16  }
  0x19   :  { %262 = vsyncadd [#allocation3], 4294967280 }
  0x1a   :  { %263 = dma.done.wait [#allocation6], 2048  }
  0x1b   :  { %264 = vsyncadd [#allocation6], 4294965248  ;;  %v271_v0 = vmov 0.0   ;;  %vm272_vm0 = vmmov 0   ;;  %v54_v1 = vld [vmem:[#allocation5 + $0x78] sm:$0xff]  ;;  %v53_v2 = vld [vmem:[#allocation5 + $0x70] sm:$0xff] }
  0x1c   :  { %159 = vmatprep.subr.mxu0 %v271_v0  ;;  %191 = vmatprep.mubr.msk.f32.mxu0 %vm272_vm0, %v271_v0  ;;  %v52_v3 = vld [vmem:[#allocation5 + $0x68] sm:$0xff]  ;;  %v51_v4 = vld [vmem:[#allocation5 + $0x60] sm:$0xff]  ;;  %v50_v5 = vld [vmem:[#allocation5 + $0x58] sm:$0xff]  ;;  %s273_s0 = smov [#allocation7]  }
  0x1d   :  { %160 = vmatpush3.msra.mxu0 %v54_v1  ;;  %v49_v6 = vld [vmem:[#allocation5 + $0x50] sm:$0xff]  ;;  %v48_v7 = vld [vmem:[#allocation5 + $0x48] sm:$0xff]  ;;  %v47_v8 = vld [vmem:[#allocation5 + $0x40] sm:$0xff]  ;;  %s132_s1 = sshll.u32 %s273_s0, 4  ;;  %s133_s1 = int_to_ptr.vmem [resolvable:$true] %s132_s1 }
  0x1e   :  { %161 = vmatprep.subr.mxu0 %v271_v0  ;;  %v46_v9 = vld [vmem:[#allocation5 + $0x38] sm:$0xff]  ;;  %v45_v10 = vld [vmem:[#allocation5 + $0x30] sm:$0xff]  ;;  %v44_v11 = vld [vmem:[#allocation5 + $0x28] sm:$0xff]  ;;  %s241_s22 = scalar_lea.vmem %s133_s1, 16  ;;  %s245_s23 = scalar_lea.vmem %s133_s1, 32 }
  0x1f   :  { %162 = vmatpush3.msra.mxu0 %v53_v2  ;;  %v43_v12 = vld [vmem:[#allocation5 + $0x20] sm:$0xff]  ;;  %v42_v13 = vld [vmem:[#allocation5 + $0x18] sm:$0xff]  ;;  %v41_v14 = vld [vmem:[#allocation5 + $0x10] sm:$0xff]  ;;  %p242_p10 = scmp.ne.s32.totalorder %s133_s1, %s241_s22  ;;  %p246_p11 = scmp.lt.s32.totalorder %s133_s1, %s133_s1 }
  0x20   :  { %163 = vmatprep.subr.mxu0 %v271_v0  ;;  %v40_v15 = vld [vmem:[#allocation5 + $0x8] sm:$0xff]  ;;  %v39_v16 = vld [vmem:[#allocation5] sm:$0xff]  ;;  %v38_v17 = vld [vmem:[#allocation2] sm:$0x1]  ;;  %p247_p12 = scmp.lt.s32.totalorder %s245_s23, %s241_s22 }
  0x21   :  { %164 = vmatpush3.msra.mxu0 %v52_v3 }
  0x22   :  { %165 = vmatprep.subr.mxu0 %v271_v0  ;;  %p248_p13 = por %p247_p12, %p246_p11 }
  0x23   :  { %166 = vmatpush3.msra.mxu0 %v51_v4 }
  0x24   :  { %167 = vmatprep.subr.mxu0 %v271_v0  ;;  %p249_p0 = pnand %p248_p13, %p242_p10 }
  0x25   :  { %168 = vmatpush3.msra.mxu0 %v50_v5 }
  0x26   :  { %169 = vmatprep.subr.mxu0 %v271_v0 }
  0x27   :  { %170 = vmatpush3.msra.mxu0 %v49_v6 }
  0x28   :  { %171 = vmatprep.subr.mxu0 %v271_v0 }
  0x29   :  { %172 = vmatpush3.msra.mxu0 %v48_v7 }
  0x2a   :  { %173 = vmatprep.subr.mxu0 %v271_v0 }
  0x2b   :  { %174 = vmatpush3.msra.mxu0 %v47_v8 }
  0x2c   :  { %175 = vmatprep.subr.mxu0 %v271_v0 }
  0x2d   :  { %176 = vmatpush3.msra.mxu0 %v46_v9 }
  0x2e   :  { %177 = vmatprep.subr.mxu0 %v271_v0 }
  0x2f   :  { %178 = vmatpush3.msra.mxu0 %v45_v10 }
  0x30   :  { %179 = vmatprep.subr.mxu0 %v271_v0 }
  0x31   :  { %180 = vmatpush3.msra.mxu0 %v44_v11 }
  0x32   :  { %181 = vmatprep.subr.mxu0 %v271_v0 }
  0x33   :  { %182 = vmatpush3.msra.mxu0 %v43_v12 }
  0x34   :  { %183 = vmatprep.subr.mxu0 %v271_v0 }
  0x35   :  { %184 = vmatpush3.msra.mxu0 %v42_v13 }
  0x36   :  { %185 = vmatprep.subr.mxu0 %v271_v0 }
  0x37   :  { %186 = vmatpush3.msra.mxu0 %v41_v14 }
  0x38   :  { %187 = vmatprep.subr.mxu0 %v271_v0 }
  0x39   :  { %188 = vmatpush3.msra.mxu0 %v40_v15 }
  0x3a   :  { %189 = vmatprep.subr.mxu0 %v271_v0 }
  0x3b   :  { %190 = vmatpush3.msra.mxu0 %v39_v16 }
  0x3c   :  { %192 = vmatmul.mubr.f32.vlgmr.msra.gmra.mxu0 %v38_v17 }
  0xfc   :  { %v121_v18 = vpop.f32.mrf.mxu0 }
  0xfd   :  { %125 = vst [vmem:[#allocation7] sm:$0x1] %v121_v18 }
  0xfe   :  { %v193_v19 = vpop.f32.mrf.mxu0 }
  0xff   :  { %252 = shalt.err (!%p249_p0)
}
 0x100   :  { %135 = dma.vmem_to_hbm [thread:$0]  %s133_s1, 16, %s300_s2, [#allocation4]  }
 0x101   :  { %265 = dma.done.wait [#allocation4], 16  }
 0x102   :  { %266 = vsyncadd [#allocation4], 4294967280 }
 0x103   :  { %139 = vsyncpa [#allocation3], 1 }
 0x104   :  { %140 = vsyncpa [#allocation6], 1 }
 0x105   :  { %141 = vsyncpa [#allocation4], 1 }

</bundles_post_ra>
